<compile_context>
chip_gen: v7x
topology: tpu7x:2x2x1
jax: 0.10.0
libtpu: 0.0.40
codegen_flags: <defaults>
</compile_context>

<pallas_src>
import jax
import jax.numpy as jnp
from jax.experimental import pallas as pl
from jax.experimental.pallas import tpu as pltpu

LANE = 128  # TPU vreg lane width


def lstm_tagger_kernel(sent_ref, emb_ref, wih_ref, whh_ref, b_ref,
                       wout_ref, bout_ref, out_ref):
    # sent_ref: (T,) int32 in SMEM      emb_ref: (V, 1, E) in VMEM
    # wih_ref:  (E, 4H)                 whh_ref: (H, 4H)
    # b_ref:    (1, 4H)                 wout_ref: (H, Tp)   bout_ref: (1, Tp)
    # out_ref:  (T, Tp)
    T = out_ref.shape[0]
    H = whh_ref.shape[0]

    # ---- fused embedding gather: dynamic index on the untiled leading dim ----
    rows = [emb_ref[sent_ref[t]] for t in range(T)]                  # T x (1, E)
    embeds = jnp.concatenate(rows, axis=0)                           # (T, E)

    # ---- hoisted input projection: one matmul for all T timesteps (+ bias) ----
    xproj = (jnp.dot(embeds, wih_ref[...],
                     preferred_element_type=jnp.float32)
             + b_ref[...])                                           # (T, 4H)

    # (H, 4H) = (32, 128) f32 -> 4 vregs: genuinely value-resident across steps.
    whh = whh_ref[...]

    h = jnp.zeros((1, H), jnp.float32)   # init_hidden(): zeros
    c = jnp.zeros((1, H), jnp.float32)

    # Fully unrolled recurrence (T is a small, static trace-time constant).
    # gates is exactly one 128-lane vreg; one sigmoid + one tanh activate it.
    h_seq = []
    for t in range(T):
        gates = xproj[t:t + 1, :] + jnp.dot(
            h, whh, preferred_element_type=jnp.float32)              # (1, 4H)
        sig = jax.nn.sigmoid(gates)                                  # 1 EUP push
        th = jnp.tanh(gates)                                         # 1 EUP push
        i_g = sig[:, 0 * H:1 * H]
        f_g = sig[:, 1 * H:2 * H]
        g_g = th[:, 2 * H:3 * H]
        o_g = sig[:, 3 * H:4 * H]
        c = f_g * c + i_g * g_g
        h = o_g * jnp.tanh(c)                                        # 1 EUP push
        h_seq.append(h)

    lstm_out = jnp.concatenate(h_seq, axis=0)                        # (T, H)

    # hidden2tag: (T, H) @ (H, Tp) + b   (padded tag lanes get bias -1e30)
    tag_space = (jnp.dot(lstm_out, wout_ref[...],
                         preferred_element_type=jnp.float32)
                 + bout_ref[...])                                    # (T, Tp)

    # log_softmax along dim=1; padded lanes contribute exp(-huge) == 0.
    m = jnp.max(tag_space, axis=1, keepdims=True)
    lse = m + jnp.log(jnp.sum(jnp.exp(tag_space - m), axis=1, keepdims=True))
    out_ref[...] = tag_space - lse                                   # lane-dense store


def lstm_tagger_forward(sentence, params):
    """sentence: (T,) int32 token ids.  Returns (T, tagset_size) log-probs."""
    emb_table = params["embedding"]                    # (V, E)
    w_ih_t = params["w_ih_t"]                          # (E, 4H)   gate order [i,f,g,o]
    w_hh_t = params["w_hh_t"]                          # (H, 4H)
    b = params["b"]                                    # (1, 4H) = b_ih + b_hh
    w_out_t = params["w_out_t"]                        # (H, tagset)
    b_out = params["b_out"]                            # (1, tagset)

    T = sentence.shape[0]
    V, E = emb_table.shape
    tagset = w_out_t.shape[1]

    # Only the tag dim gets lane padding (lane-dense output store). Zero rows
    # in the padded W_out columns keep them from touching real logits; -1e30
    # bias makes them vanish from log_softmax; sliced off below.
    Tp = max(LANE, pl.cdiv(tagset, LANE) * LANE)
    wout_p = jnp.pad(w_out_t, ((0, 0), (0, Tp - tagset)))             # (H, Tp)
    bout_p = jnp.pad(b_out, ((0, 0), (0, Tp - tagset)),
                     constant_values=-1e30)                           # (1, Tp)

    # Table reshaped so the vocab axis is an untiled leading dim -> cheap,
    # well-supported dynamic row indexing inside the kernel.
    emb3d = emb_table.reshape(V, 1, E)

    vmem = pl.BlockSpec(memory_space=pltpu.MemorySpace.VMEM)
    smem = pl.BlockSpec(memory_space=pltpu.MemorySpace.SMEM)
    scores_padded = pl.pallas_call(
        lstm_tagger_kernel,
        out_shape=jax.ShapeDtypeStruct((T, Tp), jnp.float32),
        in_specs=[smem, vmem, vmem, vmem, vmem, vmem, vmem],
        out_specs=vmem,
    )(sentence.astype(jnp.int32), emb3d, w_ih_t, w_hh_t, b, wout_p, bout_p)

    return scores_padded[:, :tagset]


def reference_forward(sentence, params):
    """Pure-JAX reference mirroring PyTorch nn.LSTM semantics."""
    emb = params["embedding"][sentence]
    H = params["w_hh_t"].shape[0]
    h = jnp.zeros((1, H), jnp.float32)
    c = jnp.zeros((1, H), jnp.float32)
    outs = []
    for t in range(sentence.shape[0]):
        x = emb[t:t + 1]
        gates = x @ params["w_ih_t"] + h @ params["w_hh_t"] + params["b"]
        i = jax.nn.sigmoid(gates[:, 0 * H:1 * H])
        f = jax.nn.sigmoid(gates[:, 1 * H:2 * H])
        g = jnp.tanh(gates[:, 2 * H:3 * H])
        o = jax.nn.sigmoid(gates[:, 3 * H:4 * H])
        c = f * c + i * g
        h = o * jnp.tanh(c)
        outs.append(h)
    lstm_out = jnp.concatenate(outs, axis=0)
    tag_space = lstm_out @ params["w_out_t"] + params["b_out"]
    return jax.nn.log_softmax(tag_space, axis=1)


def init_params(key, vocab_size, embedding_dim, hidden_size, tagset_size):
    ks = jax.random.split(key, 7)
    bound = 1.0 / jnp.sqrt(hidden_size)
    emb = jax.random.normal(ks[0], (vocab_size, embedding_dim), jnp.float32)
    w_ih = jax.random.uniform(ks[1], (4 * hidden_size, embedding_dim), jnp.float32, -bound, bound)
    w_hh = jax.random.uniform(ks[2], (4 * hidden_size, hidden_size), jnp.float32, -bound, bound)
    b_ih = jax.random.uniform(ks[3], (4 * hidden_size,), jnp.float32, -bound, bound)
    b_hh = jax.random.uniform(ks[4], (4 * hidden_size,), jnp.float32, -bound, bound)
    w_out = jax.random.uniform(ks[5], (tagset_size, hidden_size), jnp.float32, -bound, bound)
    b_out = jax.random.uniform(ks[6], (tagset_size,), jnp.float32, -bound, bound)
    return {
        "embedding": emb,
        "w_ih_t": w_ih.T,                              # (E, 4H)
        "w_hh_t": w_hh.T,                              # (H, 4H)
        "b": (b_ih + b_hh).reshape(1, 4 * hidden_size),
        "w_out_t": w_out.T,                            # (H, tagset)
        "b_out": b_out.reshape(1, tagset_size),
    }


if __name__ == "__main__":
    EMBEDDING_DIM = 32
    VOCAB_SIZE = 16
    HIDDEN_SIZE = 32
    TAGSET_SIZE = 8
    SEQ_LEN = 8

    key = jax.random.PRNGKey(0)
    pkey, skey = jax.random.split(key)
    params = init_params(pkey, VOCAB_SIZE, EMBEDDING_DIM, HIDDEN_SIZE, TAGSET_SIZE)
    sentence = jax.random.randint(skey, (SEQ_LEN,), 0, VOCAB_SIZE, dtype=jnp.int32)

    tag_scores = lstm_tagger_forward(sentence, params)
    tag_scores = jax.block_until_ready(tag_scores)

    ref = reference_forward(sentence, params)
    assert tag_scores.shape == (SEQ_LEN, TAGSET_SIZE)
    assert jnp.allclose(tag_scores, ref, rtol=1e-4, atol=1e-4)

    print("KERNEL_OK")
</pallas_src>

<mosaic_0001>
module attributes {stable_mosaic.version = 11 : i64} {
  func.func @lstm_tagger_kernel(%arg0: memref<8xi32, #tpu.memory_space<smem>>, %arg1: memref<16x1x32xf32, #tpu.memory_space<vmem>>, %arg2: memref<32x128xf32, #tpu.memory_space<vmem>>, %arg3: memref<32x128xf32, #tpu.memory_space<vmem>>, %arg4: memref<1x128xf32, #tpu.memory_space<vmem>>, %arg5: memref<32x128xf32, #tpu.memory_space<vmem>>, %arg6: memref<1x128xf32, #tpu.memory_space<vmem>>, %arg7: memref<8x128xf32, #tpu.memory_space<vmem>>) attributes {dimension_semantics = [], scalar_prefetch = 0 : i64, scratch_operands = 0 : i64, tpu.core_type = #tpu.core_type<tc>} {
    %c0 = arith.constant 0 : index
    %0 = memref.load %arg0[%c0] : memref<8xi32, #tpu.memory_space<smem>>
    %1 = arith.index_cast %0 : i32 to index
    %c0_0 = arith.constant 0 : index
    %c0_1 = arith.constant 0 : index
    %2 = vector.load %arg1[%1, %c0_0, %c0_1] : memref<16x1x32xf32, #tpu.memory_space<vmem>>, vector<1x1x32xf32>
    %3 = vector.shape_cast %2 : vector<1x1x32xf32> to vector<1x32xf32>
    %c1 = arith.constant 1 : index
    %4 = memref.load %arg0[%c1] : memref<8xi32, #tpu.memory_space<smem>>
    %5 = arith.index_cast %4 : i32 to index
    %c0_2 = arith.constant 0 : index
    %c0_3 = arith.constant 0 : index
    %6 = vector.load %arg1[%5, %c0_2, %c0_3] : memref<16x1x32xf32, #tpu.memory_space<vmem>>, vector<1x1x32xf32>
    %7 = vector.shape_cast %6 : vector<1x1x32xf32> to vector<1x32xf32>
    %c2 = arith.constant 2 : index
    %8 = memref.load %arg0[%c2] : memref<8xi32, #tpu.memory_space<smem>>
    %9 = arith.index_cast %8 : i32 to index
    %c0_4 = arith.constant 0 : index
    %c0_5 = arith.constant 0 : index
    %10 = vector.load %arg1[%9, %c0_4, %c0_5] : memref<16x1x32xf32, #tpu.memory_space<vmem>>, vector<1x1x32xf32>
    %11 = vector.shape_cast %10 : vector<1x1x32xf32> to vector<1x32xf32>
    %c3 = arith.constant 3 : index
    %12 = memref.load %arg0[%c3] : memref<8xi32, #tpu.memory_space<smem>>
    %13 = arith.index_cast %12 : i32 to index
    %c0_6 = arith.constant 0 : index
    %c0_7 = arith.constant 0 : index
    %14 = vector.load %arg1[%13, %c0_6, %c0_7] : memref<16x1x32xf32, #tpu.memory_space<vmem>>, vector<1x1x32xf32>
    %15 = vector.shape_cast %14 : vector<1x1x32xf32> to vector<1x32xf32>
    %c4 = arith.constant 4 : index
    %16 = memref.load %arg0[%c4] : memref<8xi32, #tpu.memory_space<smem>>
    %17 = arith.index_cast %16 : i32 to index
    %c0_8 = arith.constant 0 : index
    %c0_9 = arith.constant 0 : index
    %18 = vector.load %arg1[%17, %c0_8, %c0_9] : memref<16x1x32xf32, #tpu.memory_space<vmem>>, vector<1x1x32xf32>
    %19 = vector.shape_cast %18 : vector<1x1x32xf32> to vector<1x32xf32>
    %c5 = arith.constant 5 : index
    %20 = memref.load %arg0[%c5] : memref<8xi32, #tpu.memory_space<smem>>
    %21 = arith.index_cast %20 : i32 to index
    %c0_10 = arith.constant 0 : index
    %c0_11 = arith.constant 0 : index
    %22 = vector.load %arg1[%21, %c0_10, %c0_11] : memref<16x1x32xf32, #tpu.memory_space<vmem>>, vector<1x1x32xf32>
    %23 = vector.shape_cast %22 : vector<1x1x32xf32> to vector<1x32xf32>
    %c6 = arith.constant 6 : index
    %24 = memref.load %arg0[%c6] : memref<8xi32, #tpu.memory_space<smem>>
    %25 = arith.index_cast %24 : i32 to index
    %c0_12 = arith.constant 0 : index
    %c0_13 = arith.constant 0 : index
    %26 = vector.load %arg1[%25, %c0_12, %c0_13] : memref<16x1x32xf32, #tpu.memory_space<vmem>>, vector<1x1x32xf32>
    %27 = vector.shape_cast %26 : vector<1x1x32xf32> to vector<1x32xf32>
    %c7 = arith.constant 7 : index
    %28 = memref.load %arg0[%c7] : memref<8xi32, #tpu.memory_space<smem>>
    %29 = arith.index_cast %28 : i32 to index
    %c0_14 = arith.constant 0 : index
    %c0_15 = arith.constant 0 : index
    %30 = vector.load %arg1[%29, %c0_14, %c0_15] : memref<16x1x32xf32, #tpu.memory_space<vmem>>, vector<1x1x32xf32>
    %31 = vector.shape_cast %30 : vector<1x1x32xf32> to vector<1x32xf32>
    %32 = tpu.concatenate %3, %7, %11, %15, %19, %23, %27, %31 in 0 : vector<1x32xf32>, vector<1x32xf32>, vector<1x32xf32>, vector<1x32xf32>, vector<1x32xf32>, vector<1x32xf32>, vector<1x32xf32>, vector<1x32xf32> -> vector<8x32xf32>
    %c0_16 = arith.constant 0 : index
    %c0_17 = arith.constant 0 : index
    %33 = vector.load %arg2[%c0_16, %c0_17] : memref<32x128xf32, #tpu.memory_space<vmem>>, vector<32x128xf32>
    %cst = arith.constant dense<0.000000e+00> : vector<8x128xf32>
    %34 = tpu.matmul %32, %33, %cst {dimension_numbers = #tpu.dot_dimension_numbers<[1], [0], [0], [1], [0, 0, 1, 1], [], []>} : vector<8x32xf32>, vector<32x128xf32>, vector<8x128xf32> -> vector<8x128xf32>
    %c0_18 = arith.constant 0 : index
    %c0_19 = arith.constant 0 : index
    %35 = vector.load %arg4[%c0_18, %c0_19] : memref<1x128xf32, #tpu.memory_space<vmem>>, vector<1x128xf32>
    %36 = vector.broadcast %35 : vector<1x128xf32> to vector<8x128xf32>
    %37 = arith.addf %34, %36 : vector<8x128xf32>
    %c0_20 = arith.constant 0 : index
    %c0_21 = arith.constant 0 : index
    %38 = vector.load %arg3[%c0_20, %c0_21] : memref<32x128xf32, #tpu.memory_space<vmem>>, vector<32x128xf32>
    %cst_22 = arith.constant 0.000000e+00 : f32
    %39 = vector.broadcast %cst_22 : f32 to vector<1x32xf32>
    %cst_23 = arith.constant 0.000000e+00 : f32
    %40 = vector.broadcast %cst_23 : f32 to vector<1x32xf32>
    %41 = vector.extract_strided_slice %37 {offsets = [0, 0], sizes = [1, 128], strides = [1, 1]} : vector<8x128xf32> to vector<1x128xf32>
    %cst_24 = arith.constant dense<0.000000e+00> : vector<1x128xf32>
    %42 = tpu.matmul %39, %38, %cst_24 {dimension_numbers = #tpu.dot_dimension_numbers<[1], [0], [0], [1], [0, 0, 1, 1], [], []>} : vector<1x32xf32>, vector<32x128xf32>, vector<1x128xf32> -> vector<1x128xf32>
    %43 = arith.addf %41, %42 : vector<1x128xf32>
    %44 = arith.negf %43 : vector<1x128xf32>
    %45 = math.exp %44 : vector<1x128xf32>
    %cst_25 = arith.constant 1.000000e+00 : f32
    %46 = vector.broadcast %cst_25 : f32 to vector<1x128xf32>
    %47 = arith.addf %46, %45 : vector<1x128xf32>
    %48 = arith.divf %46, %47 : vector<1x128xf32>
    %49 = math.tanh %43 : vector<1x128xf32>
    %50 = vector.extract_strided_slice %48 {offsets = [0, 0], sizes = [1, 32], strides = [1, 1]} : vector<1x128xf32> to vector<1x32xf32>
    %51 = vector.extract_strided_slice %48 {offsets = [0, 32], sizes = [1, 32], strides = [1, 1]} : vector<1x128xf32> to vector<1x32xf32>
    %52 = vector.extract_strided_slice %49 {offsets = [0, 64], sizes = [1, 32], strides = [1, 1]} : vector<1x128xf32> to vector<1x32xf32>
    %53 = vector.extract_strided_slice %48 {offsets = [0, 96], sizes = [1, 32], strides = [1, 1]} : vector<1x128xf32> to vector<1x32xf32>
    %54 = arith.mulf %51, %40 : vector<1x32xf32>
    %55 = arith.mulf %50, %52 : vector<1x32xf32>
    %56 = arith.addf %54, %55 : vector<1x32xf32>
    %57 = math.tanh %56 : vector<1x32xf32>
    %58 = arith.mulf %53, %57 : vector<1x32xf32>
    %59 = vector.extract_strided_slice %37 {offsets = [1, 0], sizes = [1, 128], strides = [1, 1]} : vector<8x128xf32> to vector<1x128xf32>
    %cst_26 = arith.constant dense<0.000000e+00> : vector<1x128xf32>
    %60 = tpu.matmul %58, %38, %cst_26 {dimension_numbers = #tpu.dot_dimension_numbers<[1], [0], [0], [1], [0, 0, 1, 1], [], []>} : vector<1x32xf32>, vector<32x128xf32>, vector<1x128xf32> -> vector<1x128xf32>
    %61 = arith.addf %59, %60 : vector<1x128xf32>
    %62 = arith.negf %61 : vector<1x128xf32>
    %63 = math.exp %62 : vector<1x128xf32>
    %cst_27 = arith.constant 1.000000e+00 : f32
    %64 = vector.broadcast %cst_27 : f32 to vector<1x128xf32>
    %65 = arith.addf %64, %63 : vector<1x128xf32>
    %66 = arith.divf %64, %65 : vector<1x128xf32>
    %67 = math.tanh %61 : vector<1x128xf32>
    %68 = vector.extract_strided_slice %66 {offsets = [0, 0], sizes = [1, 32], strides = [1, 1]} : vector<1x128xf32> to vector<1x32xf32>
    %69 = vector.extract_strided_slice %66 {offsets = [0, 32], sizes = [1, 32], strides = [1, 1]} : vector<1x128xf32> to vector<1x32xf32>
    %70 = vector.extract_strided_slice %67 {offsets = [0, 64], sizes = [1, 32], strides = [1, 1]} : vector<1x128xf32> to vector<1x32xf32>
    %71 = vector.extract_strided_slice %66 {offsets = [0, 96], sizes = [1, 32], strides = [1, 1]} : vector<1x128xf32> to vector<1x32xf32>
    %72 = arith.mulf %69, %56 : vector<1x32xf32>
    %73 = arith.mulf %68, %70 : vector<1x32xf32>
    %74 = arith.addf %72, %73 : vector<1x32xf32>
    %75 = math.tanh %74 : vector<1x32xf32>
    %76 = arith.mulf %71, %75 : vector<1x32xf32>
    %77 = vector.extract_strided_slice %37 {offsets = [2, 0], sizes = [1, 128], strides = [1, 1]} : vector<8x128xf32> to vector<1x128xf32>
    %cst_28 = arith.constant dense<0.000000e+00> : vector<1x128xf32>
    %78 = tpu.matmul %76, %38, %cst_28 {dimension_numbers = #tpu.dot_dimension_numbers<[1], [0], [0], [1], [0, 0, 1, 1], [], []>} : vector<1x32xf32>, vector<32x128xf32>, vector<1x128xf32> -> vector<1x128xf32>
    %79 = arith.addf %77, %78 : vector<1x128xf32>
    %80 = arith.negf %79 : vector<1x128xf32>
    %81 = math.exp %80 : vector<1x128xf32>
    %cst_29 = arith.constant 1.000000e+00 : f32
    %82 = vector.broadcast %cst_29 : f32 to vector<1x128xf32>
    %83 = arith.addf %82, %81 : vector<1x128xf32>
    %84 = arith.divf %82, %83 : vector<1x128xf32>
    %85 = math.tanh %79 : vector<1x128xf32>
    %86 = vector.extract_strided_slice %84 {offsets = [0, 0], sizes = [1, 32], strides = [1, 1]} : vector<1x128xf32> to vector<1x32xf32>
    %87 = vector.extract_strided_slice %84 {offsets = [0, 32], sizes = [1, 32], strides = [1, 1]} : vector<1x128xf32> to vector<1x32xf32>
    %88 = vector.extract_strided_slice %85 {offsets = [0, 64], sizes = [1, 32], strides = [1, 1]} : vector<1x128xf32> to vector<1x32xf32>
    %89 = vector.extract_strided_slice %84 {offsets = [0, 96], sizes = [1, 32], strides = [1, 1]} : vector<1x128xf32> to vector<1x32xf32>
    %90 = arith.mulf %87, %74 : vector<1x32xf32>
    %91 = arith.mulf %86, %88 : vector<1x32xf32>
    %92 = arith.addf %90, %91 : vector<1x32xf32>
    %93 = math.tanh %92 : vector<1x32xf32>
    %94 = arith.mulf %89, %93 : vector<1x32xf32>
    %95 = vector.extract_strided_slice %37 {offsets = [3, 0], sizes = [1, 128], strides = [1, 1]} : vector<8x128xf32> to vector<1x128xf32>
    %cst_30 = arith.constant dense<0.000000e+00> : vector<1x128xf32>
    %96 = tpu.matmul %94, %38, %cst_30 {dimension_numbers = #tpu.dot_dimension_numbers<[1], [0], [0], [1], [0, 0, 1, 1], [], []>} : vector<1x32xf32>, vector<32x128xf32>, vector<1x128xf32> -> vector<1x128xf32>
    %97 = arith.addf %95, %96 : vector<1x128xf32>
    %98 = arith.negf %97 : vector<1x128xf32>
    %99 = math.exp %98 : vector<1x128xf32>
    %cst_31 = arith.constant 1.000000e+00 : f32
    %100 = vector.broadcast %cst_31 : f32 to vector<1x128xf32>
    %101 = arith.addf %100, %99 : vector<1x128xf32>
    %102 = arith.divf %100, %101 : vector<1x128xf32>
    %103 = math.tanh %97 : vector<1x128xf32>
    %104 = vector.extract_strided_slice %102 {offsets = [0, 0], sizes = [1, 32], strides = [1, 1]} : vector<1x128xf32> to vector<1x32xf32>
    %105 = vector.extract_strided_slice %102 {offsets = [0, 32], sizes = [1, 32], strides = [1, 1]} : vector<1x128xf32> to vector<1x32xf32>
    %106 = vector.extract_strided_slice %103 {offsets = [0, 64], sizes = [1, 32], strides = [1, 1]} : vector<1x128xf32> to vector<1x32xf32>
    %107 = vector.extract_strided_slice %102 {offsets = [0, 96], sizes = [1, 32], strides = [1, 1]} : vector<1x128xf32> to vector<1x32xf32>
    %108 = arith.mulf %105, %92 : vector<1x32xf32>
    %109 = arith.mulf %104, %106 : vector<1x32xf32>
    %110 = arith.addf %108, %109 : vector<1x32xf32>
    %111 = math.tanh %110 : vector<1x32xf32>
    %112 = arith.mulf %107, %111 : vector<1x32xf32>
    %113 = vector.extract_strided_slice %37 {offsets = [4, 0], sizes = [1, 128], strides = [1, 1]} : vector<8x128xf32> to vector<1x128xf32>
    %cst_32 = arith.constant dense<0.000000e+00> : vector<1x128xf32>
    %114 = tpu.matmul %112, %38, %cst_32 {dimension_numbers = #tpu.dot_dimension_numbers<[1], [0], [0], [1], [0, 0, 1, 1], [], []>} : vector<1x32xf32>, vector<32x128xf32>, vector<1x128xf32> -> vector<1x128xf32>
    %115 = arith.addf %113, %114 : vector<1x128xf32>
    %116 = arith.negf %115 : vector<1x128xf32>
    %117 = math.exp %116 : vector<1x128xf32>
    %cst_33 = arith.constant 1.000000e+00 : f32
    %118 = vector.broadcast %cst_33 : f32 to vector<1x128xf32>
    %119 = arith.addf %118, %117 : vector<1x128xf32>
    %120 = arith.divf %118, %119 : vector<1x128xf32>
    %121 = math.tanh %115 : vector<1x128xf32>
    %122 = vector.extract_strided_slice %120 {offsets = [0, 0], sizes = [1, 32], strides = [1, 1]} : vector<1x128xf32> to vector<1x32xf32>
    %123 = vector.extract_strided_slice %120 {offsets = [0, 32], sizes = [1, 32], strides = [1, 1]} : vector<1x128xf32> to vector<1x32xf32>
    %124 = vector.extract_strided_slice %121 {offsets = [0, 64], sizes = [1, 32], strides = [1, 1]} : vector<1x128xf32> to vector<1x32xf32>
    %125 = vector.extract_strided_slice %120 {offsets = [0, 96], sizes = [1, 32], strides = [1, 1]} : vector<1x128xf32> to vector<1x32xf32>
    %126 = arith.mulf %123, %110 : vector<1x32xf32>
    %127 = arith.mulf %122, %124 : vector<1x32xf32>
    %128 = arith.addf %126, %127 : vector<1x32xf32>
    %129 = math.tanh %128 : vector<1x32xf32>
    %130 = arith.mulf %125, %129 : vector<1x32xf32>
    %131 = vector.extract_strided_slice %37 {offsets = [5, 0], sizes = [1, 128], strides = [1, 1]} : vector<8x128xf32> to vector<1x128xf32>
    %cst_34 = arith.constant dense<0.000000e+00> : vector<1x128xf32>
    %132 = tpu.matmul %130, %38, %cst_34 {dimension_numbers = #tpu.dot_dimension_numbers<[1], [0], [0], [1], [0, 0, 1, 1], [], []>} : vector<1x32xf32>, vector<32x128xf32>, vector<1x128xf32> -> vector<1x128xf32>
    %133 = arith.addf %131, %132 : vector<1x128xf32>
    %134 = arith.negf %133 : vector<1x128xf32>
    %135 = math.exp %134 : vector<1x128xf32>
    %cst_35 = arith.constant 1.000000e+00 : f32
    %136 = vector.broadcast %cst_35 : f32 to vector<1x128xf32>
    %137 = arith.addf %136, %135 : vector<1x128xf32>
    %138 = arith.divf %136, %137 : vector<1x128xf32>
    %139 = math.tanh %133 : vector<1x128xf32>
    %140 = vector.extract_strided_slice %138 {offsets = [0, 0], sizes = [1, 32], strides = [1, 1]} : vector<1x128xf32> to vector<1x32xf32>
    %141 = vector.extract_strided_slice %138 {offsets = [0, 32], sizes = [1, 32], strides = [1, 1]} : vector<1x128xf32> to vector<1x32xf32>
    %142 = vector.extract_strided_slice %139 {offsets = [0, 64], sizes = [1, 32], strides = [1, 1]} : vector<1x128xf32> to vector<1x32xf32>
    %143 = vector.extract_strided_slice %138 {offsets = [0, 96], sizes = [1, 32], strides = [1, 1]} : vector<1x128xf32> to vector<1x32xf32>
    %144 = arith.mulf %141, %128 : vector<1x32xf32>
    %145 = arith.mulf %140, %142 : vector<1x32xf32>
    %146 = arith.addf %144, %145 : vector<1x32xf32>
    %147 = math.tanh %146 : vector<1x32xf32>
    %148 = arith.mulf %143, %147 : vector<1x32xf32>
    %149 = vector.extract_strided_slice %37 {offsets = [6, 0], sizes = [1, 128], strides = [1, 1]} : vector<8x128xf32> to vector<1x128xf32>
    %cst_36 = arith.constant dense<0.000000e+00> : vector<1x128xf32>
    %150 = tpu.matmul %148, %38, %cst_36 {dimension_numbers = #tpu.dot_dimension_numbers<[1], [0], [0], [1], [0, 0, 1, 1], [], []>} : vector<1x32xf32>, vector<32x128xf32>, vector<1x128xf32> -> vector<1x128xf32>
    %151 = arith.addf %149, %150 : vector<1x128xf32>
    %152 = arith.negf %151 : vector<1x128xf32>
    %153 = math.exp %152 : vector<1x128xf32>
    %cst_37 = arith.constant 1.000000e+00 : f32
    %154 = vector.broadcast %cst_37 : f32 to vector<1x128xf32>
    %155 = arith.addf %154, %153 : vector<1x128xf32>
    %156 = arith.divf %154, %155 : vector<1x128xf32>
    %157 = math.tanh %151 : vector<1x128xf32>
    %158 = vector.extract_strided_slice %156 {offsets = [0, 0], sizes = [1, 32], strides = [1, 1]} : vector<1x128xf32> to vector<1x32xf32>
    %159 = vector.extract_strided_slice %156 {offsets = [0, 32], sizes = [1, 32], strides = [1, 1]} : vector<1x128xf32> to vector<1x32xf32>
    %160 = vector.extract_strided_slice %157 {offsets = [0, 64], sizes = [1, 32], strides = [1, 1]} : vector<1x128xf32> to vector<1x32xf32>
    %161 = vector.extract_strided_slice %156 {offsets = [0, 96], sizes = [1, 32], strides = [1, 1]} : vector<1x128xf32> to vector<1x32xf32>
    %162 = arith.mulf %159, %146 : vector<1x32xf32>
    %163 = arith.mulf %158, %160 : vector<1x32xf32>
    %164 = arith.addf %162, %163 : vector<1x32xf32>
    %165 = math.tanh %164 : vector<1x32xf32>
    %166 = arith.mulf %161, %165 : vector<1x32xf32>
    %167 = vector.extract_strided_slice %37 {offsets = [7, 0], sizes = [1, 128], strides = [1, 1]} : vector<8x128xf32> to vector<1x128xf32>
    %cst_38 = arith.constant dense<0.000000e+00> : vector<1x128xf32>
    %168 = tpu.matmul %166, %38, %cst_38 {dimension_numbers = #tpu.dot_dimension_numbers<[1], [0], [0], [1], [0, 0, 1, 1], [], []>} : vector<1x32xf32>, vector<32x128xf32>, vector<1x128xf32> -> vector<1x128xf32>
    %169 = arith.addf %167, %168 : vector<1x128xf32>
    %170 = arith.negf %169 : vector<1x128xf32>
    %171 = math.exp %170 : vector<1x128xf32>
    %cst_39 = arith.constant 1.000000e+00 : f32
    %172 = vector.broadcast %cst_39 : f32 to vector<1x128xf32>
    %173 = arith.addf %172, %171 : vector<1x128xf32>
    %174 = arith.divf %172, %173 : vector<1x128xf32>
    %175 = math.tanh %169 : vector<1x128xf32>
    %176 = vector.extract_strided_slice %174 {offsets = [0, 0], sizes = [1, 32], strides = [1, 1]} : vector<1x128xf32> to vector<1x32xf32>
    %177 = vector.extract_strided_slice %174 {offsets = [0, 32], sizes = [1, 32], strides = [1, 1]} : vector<1x128xf32> to vector<1x32xf32>
    %178 = vector.extract_strided_slice %175 {offsets = [0, 64], sizes = [1, 32], strides = [1, 1]} : vector<1x128xf32> to vector<1x32xf32>
    %179 = vector.extract_strided_slice %174 {offsets = [0, 96], sizes = [1, 32], strides = [1, 1]} : vector<1x128xf32> to vector<1x32xf32>
    %180 = arith.mulf %177, %164 : vector<1x32xf32>
    %181 = arith.mulf %176, %178 : vector<1x32xf32>
    %182 = arith.addf %180, %181 : vector<1x32xf32>
    %183 = math.tanh %182 : vector<1x32xf32>
    %184 = arith.mulf %179, %183 : vector<1x32xf32>
    %185 = tpu.concatenate %58, %76, %94, %112, %130, %148, %166, %184 in 0 : vector<1x32xf32>, vector<1x32xf32>, vector<1x32xf32>, vector<1x32xf32>, vector<1x32xf32>, vector<1x32xf32>, vector<1x32xf32>, vector<1x32xf32> -> vector<8x32xf32>
    %c0_40 = arith.constant 0 : index
    %c0_41 = arith.constant 0 : index
    %186 = vector.load %arg5[%c0_40, %c0_41] : memref<32x128xf32, #tpu.memory_space<vmem>>, vector<32x128xf32>
    %cst_42 = arith.constant dense<0.000000e+00> : vector<8x128xf32>
    %187 = tpu.matmul %185, %186, %cst_42 {dimension_numbers = #tpu.dot_dimension_numbers<[1], [0], [0], [1], [0, 0, 1, 1], [], []>} : vector<8x32xf32>, vector<32x128xf32>, vector<8x128xf32> -> vector<8x128xf32>
    %c0_43 = arith.constant 0 : index
    %c0_44 = arith.constant 0 : index
    %188 = vector.load %arg6[%c0_43, %c0_44] : memref<1x128xf32, #tpu.memory_space<vmem>>, vector<1x128xf32>
    %189 = vector.broadcast %188 : vector<1x128xf32> to vector<8x128xf32>
    %190 = arith.addf %187, %189 : vector<8x128xf32>
    %cst_45 = arith.constant dense<0xFF800000> : vector<8xf32>
    %191 = vector.multi_reduction <maximumf>, %190, %cst_45 [1] : vector<8x128xf32> to vector<8xf32>
    %192 = vector.shape_cast %191 : vector<8xf32> to vector<8x1xf32>
    %193 = vector.broadcast %192 : vector<8x1xf32> to vector<8x128xf32>
    %194 = arith.subf %190, %193 : vector<8x128xf32>
    %195 = math.exp %194 : vector<8x128xf32>
    %cst_46 = arith.constant dense<0.000000e+00> : vector<8xf32>
    %196 = vector.multi_reduction <add>, %195, %cst_46 [1] : vector<8x128xf32> to vector<8xf32>
    %197 = vector.shape_cast %196 : vector<8xf32> to vector<8x1xf32>
    %198 = math.log %197 : vector<8x1xf32>
    %199 = arith.addf %192, %198 : vector<8x1xf32>
    %200 = vector.broadcast %199 : vector<8x1xf32> to vector<8x128xf32>
    %201 = arith.subf %190, %200 : vector<8x128xf32>
    %c0_47 = arith.constant 0 : index
    %c0_48 = arith.constant 0 : index
    %202 = vector.load %arg7[%c0_47, %c0_48] : memref<8x128xf32, #tpu.memory_space<vmem>>, vector<8x128xf32>
    tpu.vector_store %arg7[%c0_47, %c0_48], %201 {strides = array<i32>} : memref<8x128xf32, #tpu.memory_space<vmem>>, vector<8x128xf32>,
    return
  }
}

</mosaic_0001>

<bundles_post_ra>
// kernel: tpu_custom_call.1
= control target key start
LH: loop header
LB: loop body
LE: loop exit
PB: predicated region body
PF: predicated region fallthrough
CT: control target
= control target key end

     0   :  { %12 = vsyncpa [#allocation5], 0  ;;  %s1980_s0 = inlined_call_operand.hbm [shape: s32[8], index: 0, kind: input, shape index: {}]   ;;  %s1981_s1 = inlined_call_operand.hbm [shape: f32[16,1,32], index: 1, kind: input, shape index: {}]   ;;  %s1982_s2 = inlined_call_operand.hbm [shape: f32[32,128], index: 2, kind: input, shape index: {}]   ;;  %s1983_s3 = inlined_call_operand.hbm [shape: f32[32,128], index: 3, kind: input, shape index: {}]   ;;  %s1984_s4 = inlined_call_operand.vmem [shape: f32[1,128], index: 4, kind: input, shape index: {}]   ;;  %s1985_s5 = inlined_call_operand.hbm [shape: f32[32,128], index: 5, kind: input, shape index: {}]   ;;  %s1986_s6 = inlined_call_operand.vmem [shape: f32[1,128], index: 6, kind: input, shape index: {}]   ;;  %s1987_s7 = inlined_call_operand.hbm [shape: f32[8,128], index: 7, kind: output, shape index: {}]  }
   0x1   :  { %13 = vsyncpa [#allocation3], 0 }
   0x2   :  { %14 = vsyncpa [#allocation8], 0 }
   0x3   :  { %15 = vsyncpa [#allocation11], 0 }
   0x4   :  { %16 = vsyncpa [#allocation4], 0  ;;  %s1705_s24 = smov [#allocation7]   ;;  %s1575_s28 = scalar_lea.hbm %s1982_s2, 512 }
   0x5   :  { %s42_s25 = sshll.u32 %s1705_s24, 4  ;;  %p1576_p0 = scmp.ne.s32.totalorder %s1982_s2, %s1575_s28  ;;  %s43_s25 = int_to_ptr.vmem [resolvable:$true] %s42_s25 }
   0x6   :  { %p1579_p1 = scmp.lt.u32.totalorder %s1575_s28, %s1982_s2 }
   0x8   :  { %p1581_p2 = pnand %p1579_p1, %p1576_p0 }
   0xa   :  { %1584 = shalt.err (!%p1581_p2)
}
   0xb   :  { %s1585_s10 = scalar_lea.vmem %s43_s25, 512  ;;  %p1590_p4 = scmp.lt.s32.totalorder %s43_s25, %s43_s25 }
   0xc   :  { %p1586_p3 = scmp.ne.s32.totalorder %s43_s25, %s1585_s10  ;;  %p1591_p5 = scmp.lt.s32.totalorder %s1585_s10, %s1585_s10 }
   0xe   :  { %p1592_p6 = por %p1591_p5, %p1590_p4 }
  0x10   :  { %p1593_p7 = pnand %p1592_p6, %p1586_p3 }
  0x12   :  { %1596 = shalt.err (!%p1593_p7)
}
  0x13   :  { %s1706_s11 = smov 128   ;;  %s1707_s12 = smov 8  }
  0x14   :  { %48 = dma.hbm_to_vmem [thread:$0]  %s1982_s2, 512, %s43_s25, [#allocation8], %s1706_s11, %s1706_s11, %s1707_s12  }
  0x15   :  { %s1597_s17 = scalar_lea.hbm %s1980_s0, 16 }
  0x16   :  { %p1598_p8 = scmp.ne.s32.totalorder %s1980_s0, %s1597_s17  ;;  %p1601_p9 = scmp.lt.u32.totalorder %s1597_s17, %s1980_s0 }
  0x18   :  { %p1603_p10 = pnand %p1601_p9, %p1598_p8 }
  0x1a   :  { %1606 = shalt.err (!%p1603_p10)
}
  0x1b   :  { %s1708_s22 = smov [#allocation2]   ;;  %s1709_s2 = smov [#allocation6]  }
  0x1c   :  { %24 = dma.hbm_to_smem %s1980_s0, 16, %s1708_s22, [#allocation5]  }
  0x1d   :  { %s30_s25 = sshll.u32 %s1709_s2, 4  ;;  %s1607_s28 = scalar_lea.hbm %s1981_s1, 256  ;;  %s31_s25 = int_to_ptr.vmem [resolvable:$true] %s30_s25 }
  0x1e   :  { %p1608_p11 = scmp.ne.s32.totalorder %s1981_s1, %s1607_s28  ;;  %p1611_p12 = scmp.lt.u32.totalorder %s1607_s28, %s1981_s1 }
  0x20   :  { %p1613_p13 = pnand %p1611_p12, %p1608_p11 }
  0x22   :  { %1616 = shalt.err (!%p1613_p13)
}
  0x23   :  { %s1617_s10 = scalar_lea.vmem %s31_s25, 256  ;;  %p1622_p1 = scmp.lt.s32.totalorder %s31_s25, %s31_s25 }
  0x24   :  { %p1618_p0 = scmp.ne.s32.totalorder %s31_s25, %s1617_s10  ;;  %p1623_p2 = scmp.lt.s32.totalorder %s1617_s10, %s1617_s10 }
  0x26   :  { %p1624_p3 = por %p1623_p2, %p1622_p1 }
  0x28   :  { %p1625_p4 = pnand %p1624_p3, %p1618_p0 }
  0x2a   :  { %1628 = shalt.err (!%p1625_p4)
}
  0x2b   :  { %s1710_s0 = smov 16   ;;  %s1711_s13 = smov 1  }
  0x2c   :  { %36 = dma.hbm_to_vmem [thread:$0]  %s1981_s1, 256, %s31_s25, [#allocation3], %s1710_s0, %s1710_s0, %s1711_s13  }
  0x2d   :  { %s1712_s16 = smov [#allocation9]   ;;  %s1713_s18 = smov [#allocation10]  }
  0x2e   :  { %s54_s17 = sshll.u32 %s1712_s16, 4  ;;  %s68_s19 = sshll.u32 %s1713_s18, 4  ;;  %s55_s17 = int_to_ptr.vmem [resolvable:$true] %s54_s17  ;;  %s69_s19 = int_to_ptr.vmem [resolvable:$true] %s68_s19 }
  0x2f   :  { %s1629_s22 = scalar_lea.hbm %s1983_s3, 512 }
  0x30   :  { %p1630_p5 = scmp.ne.s32.totalorder %s1983_s3, %s1629_s22  ;;  %p1633_p6 = scmp.lt.u32.totalorder %s1629_s22, %s1983_s3 }
  0x32   :  { %p1635_p7 = pnand %p1633_p6, %p1630_p5 }
  0x34   :  { %1638 = shalt.err (!%p1635_p7)
}
  0x35   :  { %s1639_s1 = scalar_lea.vmem %s55_s17, 512  ;;  %p1644_p9 = scmp.lt.s32.totalorder %s55_s17, %s55_s17 }
  0x36   :  { %p1640_p8 = scmp.ne.s32.totalorder %s55_s17, %s1639_s1  ;;  %p1645_p10 = scmp.lt.s32.totalorder %s1639_s1, %s1639_s1 }
  0x38   :  { %p1646_p11 = por %p1645_p10, %p1644_p9 }
  0x3a   :  { %p1647_p12 = pnand %p1646_p11, %p1640_p8 }
  0x3c   :  { %1650 = shalt.err (!%p1647_p12)
}
  0x3d   :  { %60 = dma.hbm_to_vmem [thread:$0]  %s1983_s3, 512, %s55_s17, [#allocation8], %s1706_s11, %s1706_s11, %s1707_s12  }
  0x3e   :  { %s1651_s30 = scalar_lea.hbm %s1985_s5, 512 }
  0x3f   :  { %p1652_p13 = scmp.ne.s32.totalorder %s1985_s5, %s1651_s30  ;;  %p1655_p0 = scmp.lt.u32.totalorder %s1651_s30, %s1985_s5 }
  0x41   :  { %p1657_p1 = pnand %p1655_p0, %p1652_p13 }
  0x43   :  { %1660 = shalt.err (!%p1657_p1)
}
  0x44   :  { %s1661_s13 = scalar_lea.vmem %s69_s19, 512  ;;  %p1666_p3 = scmp.lt.s32.totalorder %s69_s19, %s69_s19 }
  0x45   :  { %p1662_p2 = scmp.ne.s32.totalorder %s69_s19, %s1661_s13  ;;  %p1667_p4 = scmp.lt.s32.totalorder %s1661_s13, %s1661_s13 }
  0x47   :  { %p1668_p5 = por %p1667_p4, %p1666_p3 }
  0x49   :  { %p1669_p6 = pnand %p1668_p5, %p1662_p2 }
  0x4b   :  { %1672 = shalt.err (!%p1669_p6)
}
  0x4c   :  { %74 = dma.hbm_to_vmem [thread:$0]  %s1985_s5, 512, %s69_s19, [#allocation11], %s1706_s11, %s1706_s11, %s1707_s12  }
  0x4d   :  { %1695 = dma.done.wait [#allocation5], 16  }
  0x4e   :  { %1696 = vsyncadd [#allocation5], 4294967280 }
  0x4f   :  { %1697 = dma.done.wait [#allocation3], 256  }
  0x50   :  { %1698 = vsyncadd [#allocation3], 4294967040 }
  0x51   :  { %1699 = dma.done.wait [#allocation8], 1024  }
  0x52   :  { %1700 = vsyncadd [#allocation8], 4294966272 }
  0x53   :  { %1701 = dma.done.wait [#allocation11], 512  }
  0x54   :  { %1702 = vsyncadd [#allocation11], 4294966784 }
  0x55   :  { %92 = sfence }
  0x56   :  { %v173_v0 = vld [vmem:[#allocation7] sm:$0xff]  ;;  %v174_v1 = vld [vmem:[#allocation7 + $0x8] sm:$0xff]  ;;  %v1714_v3 = vmov 0.0|0.0   ;;  %v175_v6 = vld [vmem:[#allocation7 + $0x10] sm:$0xff]  ;;  %s93_s5 = sld [smem:[#allocation2]]  ;;  %vm1715_vm0 = vmmov 0  }
  0x57   :  { %v258_v2 = vld [vmem:[#allocation9] sm:$0xff]  ;;  %1432 = vmatprep.subr.bf16.mxu0 %v1714_v3  ;;  %v1433_v4 = vpack.c.bf16 %v174_v1, %v173_v0  ;;  %1438 = vmatprep.subr.bf16.mxu1 %v1714_v3  ;;  %v259_v5 = vld [vmem:[#allocation9 + $0x8] sm:$0xff]  ;;  %v176_v7 = vld [vmem:[#allocation7 + $0x18] sm:$0xff]  ;;  %v1716_v11 = vmov 0.0   ;;  %s1239_s11 = sld [smem:[#allocation2 + $0x1]]  ;;  %s1240_s12 = sld [smem:[#allocation2 + $0x2]] }
  0x58   :  { %v1831_v8 = vpack.c.bf16 %v259_v5, %v258_v2  ;;  %v260_v9 = vld [vmem:[#allocation9 + $0x10] sm:$0xff]  ;;  %v261_v10 = vld [vmem:[#allocation9 + $0x18] sm:$0xff]  ;;  %1330 = vmatprep.mubr.msk.f32.mxu0 %vm1715_vm0, %v1716_v11  ;;  %1341 = vmatprep.mubr.msk.f32.mxu1 %vm1715_vm0, %v1716_v11  ;;  %v1436_v12 = vpack.c.bf16 %v176_v7, %v175_v6  ;;  %s1241_s15 = sld [smem:[#allocation2 + $0x3]]  ;;  %s1242_s16 = sld [smem:[#allocation2 + $0x4]]  ;;  %vm159_vm1 = vcmask 1040384   ;;  %vm161_vm2 = vcmask 1041408  }
  0x59   :  { %1434 = vmatpush3.bf16.msra.mxu0 %v1433_v4  ;;  %v1839_v13 = vpack.c.bf16 %v261_v10, %v260_v9  ;;  %s1243_s17 = sld [smem:[#allocation2 + $0x5]]  ;;  %s1244_s18 = sld [smem:[#allocation2 + $0x6]]  ;;  %vm163_vm3 = vcmask 1042432   ;;  %vm165_vm4 = vcmask 1043456   ;;  %vm167_vm5 = vcmask 1044480  }
  0x5a   :  { %1440 = vmatpush3.bf16.msra.mxu1 %v1831_v8  ;;  %1435 = vmatprep.subr.bf16.mxu0 %v1714_v3  ;;  %s1842_s19 = sld [smem:[#allocation2 + $0x7]]  ;;  %vm169_vm6 = vcmask 1045504   ;;  %vm171_vm7 = vcmask 1046528   ;;  %vm184_vm8 = vcmask 261120   ;;  %v1253_v31 = vld [vmem:[%s1984_s4] ss:$0 sm:$0xff] }
  0x5b   :  { %1441 = vmatprep.subr.bf16.mxu1 %v1714_v3  ;;  %s1717_s28 = smov 64   ;;  %s1718_s4 = smov 32  }
  0x5c   :  { %s94_s20 = scalar_lea.vmem [#allocation6], %s93_s5  ;;  %s1719_s8 = smov [#allocation12]  }
  0x5d   :  { %1437 = vmatpush3.bf16.msra.mxu0 %v1436_v12  ;;  %v95_v14 = vld [vmem:[%s94_s20] sm:$0x1]  ;;  %s97_s21 = scalar_lea.vmem [#allocation6], %s1239_s11  ;;  %s100_s22 = scalar_lea.vmem [#allocation6], %s1240_s12 }
  0x5e   :  { %1443 = vmatpush3.bf16.msra.mxu1 %v1839_v13  ;;  %1444 = vmatprep.subr.bf16.mxu0 %v1714_v3  ;;  %v1246_v15 = vld [vmem:[%s97_s21] ss:$0 sm:$0xff]  ;;  %s103_s23 = scalar_lea.vmem [#allocation6], %s1241_s15  ;;  %s106_s24 = scalar_lea.vmem [#allocation6], %s1242_s16 }
  0x5f   :  { %v1247_v16 = vld [vmem:[%s100_s22] ss:$0 sm:$0xff]  ;;  %1450 = vmatprep.subr.bf16.mxu1 %v1714_v3  ;;  %v160_v19 = vsel %vm159_vm1, %v95_v14, %v1246_v15  ;;  %s109_s2 = scalar_lea.vmem [#allocation6], %s1243_s17  ;;  %s112_s26 = scalar_lea.vmem [#allocation6], %s1244_s18 }
  0x60   :  { %v1248_v17 = vld [vmem:[%s103_s23] ss:$0 sm:$0xff]  ;;  %v162_v21 = vsel %vm161_vm2, %v160_v19, %v1247_v16  ;;  %s115_s1 = scalar_lea.vmem [#allocation6], %s1842_s19  ;;  %s1219_s9 = sshll.u32 %s1719_s8, 4  ;;  %s1220_s9 = int_to_ptr.vmem [resolvable:$true] %s1219_s9 }
  0x61   :  { %v1249_v18 = vld [vmem:[%s106_s24] ss:$0 sm:$0xff]  ;;  %1342 = vmatmul.mubr.f32.vlgmr.msra.gmra.mrb[0].mxu1 %v1716_v11  ;;  %v164_v23 = vsel %vm163_vm3, %v162_v21, %v1248_v17  ;;  %p1678_p8 = scmp.lt.s32.totalorder %s1220_s9, %s1220_s9 }
  0x62   :  { %v1250_v20 = vld [vmem:[%s109_s2] ss:$0 sm:$0xff]  ;;  %1452 = vmatpush3.bf16.msra.mxu1 %v1831_v8  ;;  %1363 = vmatprep.mubr.msk.f32.mxu1 %vm1715_vm0, %v1716_v11  ;;  %v166_v25 = vsel %vm165_vm4, %v164_v23, %v1249_v18 }
  0x63   :  { %v1251_v22 = vld [vmem:[%s112_s26] ss:$0 sm:$0xff]  ;;  %1453 = vmatprep.subr.bf16.mxu1 %v1714_v3  ;;  %v168_v26 = vsel %vm167_vm5, %v166_v25, %v1250_v20 }
  0x64   :  { %v1252_v24 = vld [vmem:[%s115_s1] ss:$0 sm:$0xff]  ;;  %v170_v27 = vsel %vm169_vm6, %v168_v26, %v1251_v22 }
  0x65   :  { %v172_v28 = vsel %vm171_vm7, %v170_v27, %v1252_v24 }
  0x66   :  { %1455 = vmatpush3.bf16.msra.mxu1 %v1839_v13  ;;  %1331 = vmatmul.mubr.msk.f32.vlgmr.msra.gmra.mrb[0].mxu0 %vm184_vm8, %v172_v28 }
  0x67   :  { %1462 = vmatprep.subr.bf16.mxu1 %v1714_v3  ;;  %1446 = vmatpush3.bf16.msra.mxu0 %v1831_v8 }
  0x68   :  { %1352 = vmatprep.mubr.msk.f32.mxu0 %vm1715_vm0, %v1716_v11  ;;  %1447 = vmatprep.subr.bf16.mxu0 %v1714_v3 }
  0x6b   :  { %1449 = vmatpush3.bf16.msra.mxu0 %v1839_v13 }
  0x6c   :  { %1456 = vmatprep.subr.bf16.mxu0 %v1714_v3 }
 0x134   :  { %v331_v29 = vpop.f32.mrb[0].mxu1 }
 0x135   :  { %v1343_v30 = vpop.f32.mrb[1].mxu1 }
 0x139   :  { %v254_v32 = vpop.f32.mrb[0].mxu0 }
 0x13a   :  { %v1872_v33 = vadd.f32 %v1253_v31, %v254_v32  ;;  %v1332_v34 = vpop.f32.mrb[1].mxu0 }
 0x13c   :  { %v335_v35 = vadd.f32 %v331_v29, %v1872_v33 }
 0x13e   :  { %1507 = vtanh.f32 %v335_v35  ;;  %v1255_v37 = vmul.f32 -1.442695, %v335_v35 }
 0x140   :  { %1509 = vpow2.f32 %v1255_v37 }
 0x148   :  { %v1508_v36 = vpop.eup %1507 }
 0x149   :  { %345 = vrot.lane.b32.xlu0 %v1508_v36, %s1717_s28 }
 0x14a   :  { %v1510_v38 = vpop.eup %1509 }
 0x14b   :  { %v339_v39 = vadd.f32 1.0, %v1510_v38 }
 0x14d   :  { %1511 = vrcp.f32 %v339_v39 }
 0x157   :  { %v1512_v40 = vpop.eup %1511 }
 0x158   :  { %v343_v43 = vmul.f32 0.0, %v1512_v40 }
 0x1bb   :  { %v346_v41 = vpop.permute.xlu0 %345 }
 0x1bc   :  { %v348_v42 = vmul.f32 %v1512_v40, %v346_v41 }
 0x1be   :  { %350 = vrot.lane.b32.xlu0 %v348_v42, %s1718_s4 }
 0x230   :  { %v351_v44 = vpop.permute.xlu0 %350 }
 0x231   :  { %v353_v45 = vadd.f32 %v351_v44, %v343_v43 }
 0x233   :  { %1513 = vtanh.f32 %v353_v45  ;;  %v447_v61 = vrot.slane %v353_v45, 7 }
 0x23d   :  { %v1514_v46 = vpop.eup %1513 }
 0x23e   :  { %356 = vrot.lane.b32.xlu1 %v1514_v46, %s1717_s28 }
 0x2b0   :  { %v357_v47 = vpop.permute.xlu1 %356 }
 0x2b1   :  { %v1878_v48 = vmul.f32 %v1512_v40, %v357_v47 }
 0x2b3   :  { %361 = vrot.lane.b32.xlu1 %v1878_v48, %s1718_s4 }
 0x325   :  { %v362_v49 = vpop.permute.xlu1 %361 }
 0x326   :  { %1353 = vmatmul.mubr.msk.f32.vlgmr.msra.gmra.mrb[2].mxu0 %vm184_vm8, %v362_v49 }
 0x327   :  { %1458 = vmatpush3.bf16.msra.mxu0 %v1831_v8  ;;  %1374 = vmatprep.mubr.msk.f32.mxu0 %vm1715_vm0, %v1716_v11 }
 0x328   :  { %1459 = vmatprep.subr.bf16.mxu0 %v1714_v3 }
 0x32b   :  { %1461 = vmatpush3.bf16.msra.mxu0 %v1839_v13 }
 0x32c   :  { %1468 = vmatprep.subr.bf16.mxu0 %v1714_v3 }
 0x3f9   :  { %v431_v50 = vpop.f32.mrb[2].mxu0 }
 0x3fa   :  { %v436_v51 = vrot.slane %v431_v50, 7  ;;  %v1354_v52 = vpop.f32.mrb[3].mxu0 }
 0x3fc   :  { %v438_v53 = vadd.f32 %v436_v51, %v1872_v33 }
 0x3fe   :  { %1515 = vtanh.f32 %v438_v53  ;;  %v1257_v55 = vmul.f32 -1.442695, %v438_v53 }
 0x400   :  { %1517 = vpow2.f32 %v1257_v55 }
 0x408   :  { %v1516_v54 = vpop.eup %1515 }
 0x409   :  { %451 = vrot.lane.b32.xlu0 %v1516_v54, %s1717_s28 }
 0x40a   :  { %v1518_v56 = vpop.eup %1517 }
 0x40b   :  { %v442_v57 = vadd.f32 1.0, %v1518_v56 }
 0x40d   :  { %1519 = vrcp.f32 %v442_v57 }
 0x417   :  { %v1520_v58 = vpop.eup %1519 }
 0x418   :  { %v449_v62 = vmul.f32 %v1520_v58, %v447_v61 }
 0x47b   :  { %v452_v59 = vpop.permute.xlu0 %451 }
 0x47c   :  { %v454_v60 = vmul.f32 %v1520_v58, %v452_v59 }
 0x47e   :  { %456 = vrot.lane.b32.xlu1 %v454_v60, %s1718_s4 }
 0x4f0   :  { %v457_v63 = vpop.permute.xlu1 %456 }
 0x4f1   :  { %v459_v0 = vadd.f32 %v457_v63, %v449_v62 }
 0x4f3   :  { %1521 = vtanh.f32 %v459_v0  ;;  %v554_v21 = vrot.slane %v459_v0, 7 }
 0x4fd   :  { %v1522_v1 = vpop.eup %1521 }
 0x4fe   :  { %462 = vrot.lane.b32.xlu0 %v1522_v1, %s1717_s28 }
 0x570   :  { %v463_v2 = vpop.permute.xlu0 %462 }
 0x571   :  { %v465_v4 = vmul.f32 %v1520_v58, %v463_v2 }
 0x573   :  { %v467_v5 = vrot.slane %v465_v4, 1  ;;  %v1108_v28 = vsel %vm159_vm1, %v1878_v48, %v465_v4 }
 0x575   :  { %468 = vrot.lane.b32.xlu1 %v467_v5, %s1718_s4 }
 0x5e7   :  { %v469_v6 = vpop.permute.xlu1 %468 }
 0x5e8   :  { %1364 = vmatmul.mubr.msk.f32.vlgmr.msra.gmra.mrb[2].mxu1 %vm184_vm8, %v469_v6 }
 0x5e9   :  { %1464 = vmatpush3.bf16.msra.mxu1 %v1831_v8  ;;  %1385 = vmatprep.mubr.msk.f32.mxu1 %vm1715_vm0, %v1716_v11 }
 0x5ea   :  { %1465 = vmatprep.subr.bf16.mxu1 %v1714_v3 }
 0x5ed   :  { %1467 = vmatpush3.bf16.msra.mxu1 %v1839_v13 }
 0x5ee   :  { %1474 = vmatprep.subr.bf16.mxu1 %v1714_v3 }
 0x6bb   :  { %v538_v7 = vpop.f32.mrb[2].mxu1 }
 0x6bc   :  { %v543_v9 = vrot.slane %v538_v7, 6  ;;  %v1365_v10 = vpop.f32.mrb[3].mxu1 }
 0x6be   :  { %v545_v12 = vadd.f32 %v543_v9, %v1872_v33 }
 0x6c0   :  { %1523 = vtanh.f32 %v545_v12  ;;  %v1259_v15 = vmul.f32 -1.442695, %v545_v12 }
 0x6c2   :  { %1525 = vpow2.f32 %v1259_v15 }
 0x6ca   :  { %v1524_v14 = vpop.eup %1523 }
 0x6cb   :  { %558 = vrot.lane.b32.xlu0 %v1524_v14, %s1717_s28 }
 0x6cc   :  { %v1526_v16 = vpop.eup %1525 }
 0x6cd   :  { %v549_v17 = vadd.f32 1.0, %v1526_v16 }
 0x6cf   :  { %1527 = vrcp.f32 %v549_v17 }
 0x6d9   :  { %v1528_v18 = vpop.eup %1527 }
 0x6da   :  { %v556_v22 = vmul.f32 %v1528_v18, %v554_v21 }
 0x73d   :  { %v559_v19 = vpop.permute.xlu0 %558 }
 0x73e   :  { %v561_v20 = vmul.f32 %v1528_v18, %v559_v19 }
 0x740   :  { %563 = vrot.lane.b32.xlu1 %v561_v20, %s1718_s4 }
 0x7b2   :  { %v564_v23 = vpop.permute.xlu1 %563 }
 0x7b3   :  { %v566_v24 = vadd.f32 %v564_v23, %v556_v22 }
 0x7b5   :  { %1529 = vtanh.f32 %v566_v24  ;;  %v661_v44 = vrot.slane %v566_v24, 7 }
 0x7bf   :  { %v1530_v25 = vpop.eup %1529 }
 0x7c0   :  { %569 = vrot.lane.b32.xlu0 %v1530_v25, %s1717_s28 }
 0x832   :  { %v570_v26 = vpop.permute.xlu0 %569 }
 0x833   :  { %v572_v27 = vmul.f32 %v1528_v18, %v570_v26 }
 0x835   :  { %v574_v29 = vrot.slane %v572_v27, 2  ;;  %v1109_v30 = vsel %vm161_vm2, %v1108_v28, %v572_v27 }
 0x837   :  { %575 = vrot.lane.b32.xlu1 %v574_v29, %s1718_s4 }
 0x8a9   :  { %v576_v31 = vpop.permute.xlu1 %575 }
 0x8aa   :  { %1375 = vmatmul.mubr.msk.f32.vlgmr.msra.gmra.mrb[4].mxu0 %vm184_vm8, %v576_v31 }
 0x8ab   :  { %1470 = vmatpush3.bf16.msra.mxu0 %v1831_v8  ;;  %1396 = vmatprep.mubr.msk.f32.mxu0 %vm1715_vm0, %v1716_v11 }
 0x8ac   :  { %1471 = vmatprep.subr.bf16.mxu0 %v1714_v3 }
 0x8af   :  { %1473 = vmatpush3.bf16.msra.mxu0 %v1839_v13 }
 0x8b0   :  { %1480 = vmatprep.subr.bf16.mxu0 %v1714_v3 }
 0x97d   :  { %v645_v32 = vpop.f32.mrb[4].mxu0 }
 0x97e   :  { %v650_v34 = vrot.slane %v645_v32, 5  ;;  %v1376_v35 = vpop.f32.mrb[5].mxu0 }
 0x980   :  { %v652_v36 = vadd.f32 %v650_v34, %v1872_v33 }
 0x982   :  { %1531 = vtanh.f32 %v652_v36  ;;  %v1261_v38 = vmul.f32 -1.442695, %v652_v36 }
 0x984   :  { %1533 = vpow2.f32 %v1261_v38 }
 0x98c   :  { %v1532_v37 = vpop.eup %1531 }
 0x98d   :  { %665 = vrot.lane.b32.xlu0 %v1532_v37, %s1717_s28 }
 0x98e   :  { %v1534_v39 = vpop.eup %1533 }
 0x98f   :  { %v656_v40 = vadd.f32 1.0, %v1534_v39 }
 0x991   :  { %1535 = vrcp.f32 %v656_v40 }
 0x99b   :  { %v1536_v41 = vpop.eup %1535 }
 0x99c   :  { %v663_v45 = vmul.f32 %v1536_v41, %v661_v44 }
 0x9ff   :  { %v666_v42 = vpop.permute.xlu0 %665 }
 0xa00   :  { %v668_v43 = vmul.f32 %v1536_v41, %v666_v42 }
 0xa02   :  { %670 = vrot.lane.b32.xlu1 %v668_v43, %s1718_s4 }
 0xa74   :  { %v671_v46 = vpop.permute.xlu1 %670 }
 0xa75   :  { %v673_v47 = vadd.f32 %v671_v46, %v663_v45 }
 0xa77   :  { %1537 = vtanh.f32 %v673_v47  ;;  %v768_v1 = vrot.slane %v673_v47, 7 }
 0xa81   :  { %v1538_v48 = vpop.eup %1537 }
 0xa82   :  { %676 = vrot.lane.b32.xlu0 %v1538_v48, %s1717_s28 }
 0xaf4   :  { %v677_v49 = vpop.permute.xlu0 %676 }
 0xaf5   :  { %v679_v50 = vmul.f32 %v1536_v41, %v677_v49 }
 0xaf7   :  { %v681_v51 = vrot.slane %v679_v50, 3  ;;  %v1110_v52 = vsel %vm163_vm3, %v1109_v30, %v679_v50 }
 0xaf9   :  { %682 = vrot.lane.b32.xlu1 %v681_v51, %s1718_s4 }
 0xb6b   :  { %v683_v53 = vpop.permute.xlu1 %682 }
 0xb6c   :  { %1386 = vmatmul.mubr.msk.f32.vlgmr.msra.gmra.mrb[4].mxu1 %vm184_vm8, %v683_v53 }
 0xb6d   :  { %1476 = vmatpush3.bf16.msra.mxu1 %v1831_v8  ;;  %1407 = vmatprep.mubr.msk.f32.mxu1 %vm1715_vm0, %v1716_v11 }
 0xb6e   :  { %1477 = vmatprep.subr.bf16.mxu1 %v1714_v3 }
 0xb71   :  { %1479 = vmatpush3.bf16.msra.mxu1 %v1839_v13 }
 0xb72   :  { %1486 = vmatprep.subr.bf16.mxu1 %v1714_v3 }
 0xc3f   :  { %v752_v54 = vpop.f32.mrb[4].mxu1 }
 0xc40   :  { %v757_v55 = vrot.slane %v752_v54, 4  ;;  %v1387_v56 = vpop.f32.mrb[5].mxu1 }
 0xc42   :  { %v759_v57 = vadd.f32 %v757_v55, %v1872_v33 }
 0xc44   :  { %1539 = vtanh.f32 %v759_v57  ;;  %v1263_v59 = vmul.f32 -1.442695, %v759_v57 }
 0xc46   :  { %1541 = vpow2.f32 %v1263_v59 }
 0xc4e   :  { %v1540_v58 = vpop.eup %1539 }
 0xc4f   :  { %772 = vrot.lane.b32.xlu0 %v1540_v58, %s1717_s28 }
 0xc50   :  { %v1542_v60 = vpop.eup %1541 }
 0xc51   :  { %v763_v61 = vadd.f32 1.0, %v1542_v60 }
 0xc53   :  { %1543 = vrcp.f32 %v763_v61 }
 0xc5d   :  { %v1544_v62 = vpop.eup %1543 }
 0xc5e   :  { %v770_v2 = vmul.f32 %v1544_v62, %v768_v1 }
 0xcc1   :  { %v773_v63 = vpop.permute.xlu0 %772 }
 0xcc2   :  { %v775_v0 = vmul.f32 %v1544_v62, %v773_v63 }
 0xcc4   :  { %777 = vrot.lane.b32.xlu1 %v775_v0, %s1718_s4 }
 0xd36   :  { %v778_v4 = vpop.permute.xlu1 %777 }
 0xd37   :  { %v780_v5 = vadd.f32 %v778_v4, %v770_v2 }
 0xd39   :  { %1545 = vtanh.f32 %v780_v5 }
 0xd43   :  { %v1546_v6 = vpop.eup %1545 }
 0xd44   :  { %783 = vrot.lane.b32.xlu0 %v1546_v6, %s1717_s28 }
 0xdb6   :  { %v784_v7 = vpop.permute.xlu0 %783 }
 0xdb7   :  { %v786_v9 = vmul.f32 %v1544_v62, %v784_v7  ;;  %v1116_v7 = vld [vmem:[#allocation10 + $0x8] sm:$0xff] }
 0xdb9   :  { %v788_v10 = vrot.slane %v786_v9, 4  ;;  %v1111_v12 = vsel %vm165_vm4, %v1110_v52, %v786_v9  ;;  %v1117_v9 = vld [vmem:[#allocation10 + $0x10] sm:$0xff] }
 0xdbb   :  { %789 = vrot.lane.b32.xlu1 %v788_v10, %s1718_s4 }
 0xe2d   :  { %v790_v14 = vpop.permute.xlu1 %789 }
 0xe2e   :  { %1397 = vmatmul.mubr.msk.f32.vlgmr.msra.gmra.mrb[6].mxu0 %vm184_vm8, %v790_v14 }
 0xe2f   :  { %1482 = vmatpush3.bf16.msra.mxu0 %v1831_v8  ;;  %1418 = vmatprep.mubr.msk.f32.mxu0 %vm1715_vm0, %v1716_v11 }
 0xe30   :  { %1483 = vmatprep.subr.bf16.mxu0 %v1714_v3 }
 0xe33   :  { %1485 = vmatpush3.bf16.msra.mxu0 %v1839_v13  ;;  %v875_v13 = vrot.slane %v780_v5, 7 }
 0xf01   :  { %v859_v15 = vpop.f32.mrb[6].mxu0 }
 0xf02   :  { %v864_v16 = vrot.slane %v859_v15, 3  ;;  %v1398_v17 = vpop.f32.mrb[7].mxu0 }
 0xf04   :  { %v866_v18 = vadd.f32 %v864_v16, %v1872_v33 }
 0xf06   :  { %1547 = vtanh.f32 %v866_v18  ;;  %v1265_v20 = vmul.f32 -1.442695, %v866_v18 }
 0xf08   :  { %1549 = vpow2.f32 %v1265_v20  ;;  %v1270_v20 = vld [vmem:[%s1986_s6] ss:$0 sm:$0xff]  ;;  %s1673_s6 = scalar_lea.vmem %s1220_s9, 128 }
 0xf09   :  { %p1674_p7 = scmp.ne.s32.totalorder %s1220_s9, %s1673_s6  ;;  %p1679_p9 = scmp.lt.s32.totalorder %s1673_s6, %s1673_s6 }
 0xf0b   :  { %p1680_p10 = por %p1679_p9, %p1678_p8 }
 0xf0d   :  { %p1681_p11 = pnand %p1680_p10, %p1674_p7 }
 0xf10   :  { %v1548_v19 = vpop.eup %1547 }
 0xf11   :  { %879 = vrot.lane.b32.xlu0 %v1548_v19, %s1717_s28 }
 0xf12   :  { %v1550_v21 = vpop.eup %1549 }
 0xf13   :  { %v870_v8 = vadd.f32 1.0, %v1550_v21 }
 0xf15   :  { %1551 = vrcp.f32 %v870_v8 }
 0xf1f   :  { %v1552_v22 = vpop.eup %1551 }
 0xf20   :  { %v877_v25 = vmul.f32 %v1552_v22, %v875_v13 }
 0xf83   :  { %v880_v23 = vpop.permute.xlu0 %879 }
 0xf84   :  { %v882_v24 = vmul.f32 %v1552_v22, %v880_v23 }
 0xf86   :  { %884 = vrot.lane.b32.xlu1 %v882_v24, %s1718_s4 }
 0xff8   :  { %v885_v26 = vpop.permute.xlu1 %884 }
 0xff9   :  { %v887_v27 = vadd.f32 %v885_v26, %v877_v25 }
 0xffb   :  { %1553 = vtanh.f32 %v887_v27 }
0x1005   :  { %v1554_v28 = vpop.eup %1553 }
0x1006   :  { %890 = vrot.lane.b32.xlu0 %v1554_v28, %s1717_s28 }
0x1078   :  { %v891_v29 = vpop.permute.xlu0 %890 }
0x1079   :  { %v893_v30 = vmul.f32 %v1552_v22, %v891_v29 }
0x107b   :  { %v895_v31 = vrot.slane %v893_v30, 5  ;;  %v1112_v32 = vsel %vm167_vm5, %v1111_v12, %v893_v30  ;;  %v1118_v12 = vld [vmem:[#allocation10 + $0x18] sm:$0xff] }
0x107c   :  { %v1490_v14 = vpack.c.bf16 %v1118_v12, %v1117_v9 }
0x107d   :  { %896 = vrot.lane.b32.xlu1 %v895_v31, %s1718_s4 }
0x10ef   :  { %v897_v34 = vpop.permute.xlu1 %896 }
0x10f0   :  { %1408 = vmatmul.mubr.msk.f32.vlgmr.msra.gmra.mrb[6].mxu1 %vm184_vm8, %v897_v34 }
0x10f1   :  { %1429 = vmatprep.mubr.msk.f32.mxu1 %vm1715_vm0, %v1716_v11  ;;  %v982_v11 = vrot.slane %v887_v27, 7 }
0x11c3   :  { %v966_v35 = vpop.f32.mrb[6].mxu1 }
0x11c4   :  { %v971_v36 = vrot.slane %v966_v35, 2  ;;  %v1409_v37 = vpop.f32.mrb[7].mxu1 }
0x11c6   :  { %v973_v38 = vadd.f32 %v971_v36, %v1872_v33 }
0x11c8   :  { %1555 = vtanh.f32 %v973_v38  ;;  %v1267_v40 = vmul.f32 -1.442695, %v973_v38 }
0x11ca   :  { %1557 = vpow2.f32 %v1267_v40 }
0x11d2   :  { %v1556_v39 = vpop.eup %1555 }
0x11d3   :  { %986 = vrot.lane.b32.xlu0 %v1556_v39, %s1717_s28 }
0x11d4   :  { %v1558_v41 = vpop.eup %1557 }
0x11d5   :  { %v977_v42 = vadd.f32 1.0, %v1558_v41 }
0x11d7   :  { %1559 = vrcp.f32 %v977_v42 }
0x11e1   :  { %v1560_v43 = vpop.eup %1559 }
0x11e2   :  { %v984_v46 = vmul.f32 %v1560_v43, %v982_v11 }
0x1245   :  { %v987_v44 = vpop.permute.xlu0 %986 }
0x1246   :  { %v989_v45 = vmul.f32 %v1560_v43, %v987_v44 }
0x1248   :  { %991 = vrot.lane.b32.xlu1 %v989_v45, %s1718_s4 }
0x12ba   :  { %v992_v47 = vpop.permute.xlu1 %991 }
0x12bb   :  { %v994_v48 = vadd.f32 %v992_v47, %v984_v46 }
0x12bd   :  { %1561 = vtanh.f32 %v994_v48  ;;  %v1089_v2 = vrot.slane %v994_v48, 7 }
0x12c7   :  { %v1562_v49 = vpop.eup %1561 }
0x12c8   :  { %997 = vrot.lane.b32.xlu0 %v1562_v49, %s1717_s28 }
0x133a   :  { %v998_v50 = vpop.permute.xlu0 %997 }
0x133b   :  { %v1000_v51 = vmul.f32 %v1560_v43, %v998_v50 }
0x133d   :  { %v1002_v52 = vrot.slane %v1000_v51, 6  ;;  %v1113_v53 = vsel %vm169_vm6, %v1112_v32, %v1000_v51 }
0x133f   :  { %1003 = vrot.lane.b32.xlu1 %v1002_v52, %s1718_s4 }
0x13b1   :  { %v1004_v54 = vpop.permute.xlu1 %1003 }
0x13b2   :  { %1419 = vmatmul.mubr.msk.f32.vlgmr.msra.gmra.mrb[8].mxu0 %vm184_vm8, %v1004_v54 }
0x1485   :  { %v1073_v55 = vpop.f32.mrb[8].mxu0 }
0x1486   :  { %v1078_v56 = vrot.slane %v1073_v55, 1  ;;  %v1420_v57 = vpop.f32.mrb[9].mxu0 }
0x1488   :  { %v1080_v58 = vadd.f32 %v1078_v56, %v1872_v33  ;;  %v1115_v33 = vld [vmem:[#allocation10] sm:$0xff] }
0x1489   :  { %v1487_v10 = vpack.c.bf16 %v1116_v7, %v1115_v33 }
0x148a   :  { %1563 = vtanh.f32 %v1080_v58  ;;  %v1269_v60 = vmul.f32 -1.442695, %v1080_v58 }
0x148b   :  { %1488 = vmatpush3.bf16.msra.mxu1 %v1487_v10 }
0x148c   :  { %1565 = vpow2.f32 %v1269_v60  ;;  %1489 = vmatprep.subr.bf16.mxu1 %v1714_v3 }
0x148f   :  { %1491 = vmatpush3.bf16.msra.mxu1 %v1490_v14 }
0x1494   :  { %v1564_v59 = vpop.eup %1563 }
0x1495   :  { %1093 = vrot.lane.b32.xlu0 %v1564_v59, %s1717_s28 }
0x1496   :  { %v1566_v61 = vpop.eup %1565 }
0x1497   :  { %v1084_v62 = vadd.f32 1.0, %v1566_v61 }
0x1499   :  { %1567 = vrcp.f32 %v1084_v62 }
0x14a3   :  { %v1568_v63 = vpop.eup %1567 }
0x14a4   :  { %v1091_v4 = vmul.f32 %v1568_v63, %v1089_v2 }
0x1507   :  { %v1094_v0 = vpop.permute.xlu0 %1093 }
0x1508   :  { %v1096_v1 = vmul.f32 %v1568_v63, %v1094_v0 }
0x150a   :  { %1098 = vrot.lane.b32.xlu1 %v1096_v1, %s1718_s4 }
0x157c   :  { %v1099_v5 = vpop.permute.xlu1 %1098 }
0x157d   :  { %v1101_v6 = vadd.f32 %v1099_v5, %v1091_v4 }
0x157f   :  { %1569 = vtanh.f32 %v1101_v6 }
0x1589   :  { %v1570_v15 = vpop.eup %1569 }
0x158a   :  { %1104 = vrot.lane.b32.xlu0 %v1570_v15, %s1717_s28 }
0x15fc   :  { %v1105_v16 = vpop.permute.xlu0 %1104 }
0x15fd   :  { %v1107_v17 = vmul.f32 %v1568_v63, %v1105_v16 }
0x15ff   :  { %v1114_v18 = vsel %vm171_vm7, %v1113_v53, %v1107_v17 }
0x1600   :  { %1127 = vrot.lane.b32.xlu1 %v1114_v18, %s1718_s4 }
0x1672   :  { %v1128_v19 = vpop.permute.xlu1 %1127 }
0x1673   :  { %1430 = vmatmul.mubr.msk.f32.vlgmr.msra.gmra.mrb[8].mxu1 %vm184_vm8, %v1128_v19 }
0x1746   :  { %v1197_v21 = vpop.f32.mrb[8].mxu1 }
0x1747   :  { %v1198_v8 = vadd.f32 %v1270_v20, %v1197_v21  ;;  %v1431_v3 = vpop.f32.mrb[9].mxu1 }
0x1749   :  { %1201 = vmax.xlane.f32.xlu0 %v1198_v8 }
0x17d6   :  { %v1202_v22 = vpop.xlane.xlu0 %1201 }
0x17d7   :  { %v1203_v23 = vsub.f32 %v1198_v8, %v1202_v22 }
0x17d9   :  { %v1204_v24 = vmul.f32 1.442695, %v1203_v23 }
0x17db   :  { %1571 = vpow2.f32 %v1204_v24 }
0x17e5   :  { %v1572_v13 = vpop.eup %1571 }
0x17e6   :  { %1206 = vadd.xlane.f32.xlu1 %v1572_v13 }
0x1873   :  { %v1207_v25 = vpop.xlane.xlu1 %1206 }
0x1874   :  { %1573 = vlog2.f32 %v1207_v25 }
0x187e   :  { %v1574_v26 = vpop.eup %1573 }
0x187f   :  { %v1209_v27 = vmul.f32 0.6931472, %v1574_v26 }
0x1881   :  { %v1210_v28 = vadd.f32 %v1209_v27, %v1202_v22 }
0x1883   :  { %v1211_v29 = vsub.f32 %v1198_v8, %v1210_v28 }
0x1885   :  { %1212 = vst [vmem:[#allocation12] sm:$0xff] %v1211_v29 }
0x1886   :  { %1684 = shalt.err (!%p1681_p11)
}
0x1887   :  { %s1685_s13 = scalar_lea.hbm %s1987_s7, 128 }
0x1888   :  { %p1686_p12 = scmp.ne.s32.totalorder %s1987_s7, %s1685_s13  ;;  %p1689_p13 = scmp.lt.u32.totalorder %s1685_s13, %s1987_s7 }
0x188a   :  { %p1691_p0 = pnand %p1689_p13, %p1686_p12 }
0x188c   :  { %1694 = shalt.err (!%p1691_p0)
}
0x188d   :  { %1222 = dma.vmem_to_hbm [thread:$0]  %s1220_s9, 128, %s1987_s7, [#allocation4]  }
0x188e   :  { %1703 = dma.done.wait [#allocation4], 128  }
0x188f   :  { %1704 = vsyncadd [#allocation4], 4294967168 }
0x1890   :  { %1226 = vsyncpa [#allocation3], 1 }
0x1891   :  { %1227 = vsyncpa [#allocation8], 1 }
0x1892   :  { %1228 = vsyncpa [#allocation11], 1 }
0x1893   :  { %1229 = vsyncpa [#allocation4], 1 }
0x1894   :  { %1230 = vsyncpa [#allocation5], 1 }

</bundles_post_ra>
